<compile_context>
chip_gen: v6e
topology: v6e:2x2x1
jax: 0.10.0
libtpu: 0.0.40
codegen_flags: <defaults>
</compile_context>

<pallas_src>
import functools

import jax
import jax.numpy as jnp
from jax import lax
from jax.experimental import pallas as pl
from jax.experimental.pallas import tpu as pltpu

BITS = (2, 4, 8)      # TODO(synk): qconfig.bits is external config; representative widths chosen.
_QROWS = 1024         # row-tile for the element-wise quant kernels ((1024,128) f32 = 512 KiB/block)


def _round_up(v, m):
    return ((v + m - 1) // m) * m


@functools.lru_cache(maxsize=1)
def _vmem_capacity_bytes():
    """Physical VMEM of the attached chip (generation-aware: 64 MiB v7x, 128 MiB v5e/v6e)."""
    try:
        cap = int(getattr(pltpu.get_tpu_info(), "vmem_capacity_bytes", 0))
        if cap > 0:
            return cap
    except Exception:
        pass
    return 64 * 1024 * 1024    # conservative default (v7x physical)


def _vmem_limit_bytes():
    return int(min(_vmem_capacity_bytes(), 128 * 1024 * 1024) * 3 // 4)


# ----------------------------- Pallas kernels -----------------------------

def absmax_kernel(x_ref, m_ref):
    """Pass 1: global max(|x|) accumulated across grid steps in a resident (1,1) block."""
    @pl.when(pl.program_id(0) == 0)
    def _init():
        m_ref[...] = jnp.zeros_like(m_ref)
    blk = jnp.max(jnp.abs(x_ref[...]), axis=(0, 1), keepdims=True)
    m_ref[...] = jnp.maximum(m_ref[...], blk)


def quant_blend_kernel(s_ref, x_ref, o_ref):
    """Pass 2: out = sum_i alpha_i * fake_quant_{bit_i}(x), scales precomputed (SMEM).

    s_ref layout: [inv_m, alpha_0*m/lv_0, alpha_1*m/lv_1, ...]  -> no division in-kernel.
    """
    x = x_ref[...]
    xn = jnp.clip(x * s_ref[0], -1.0, 1.0)
    acc = jnp.zeros_like(x)
    for idx, bit in enumerate(BITS):
        lv = float(2 ** (bit - 1) - 1)
        acc = acc + jnp.round(xn * lv) * s_ref[idx + 1]
    o_ref[...] = acc.astype(o_ref.dtype)


def conv_kernel(x0_ref, x1_ref, w_ref, b_ref, o_ref, *, tap_offsets, tm):
    """One (sample, M-tile) per grid step; im2col fused as one K = kh*kw*Cin_pad MXU matmul.

    x0/x1: two consecutive TM-wide channel-major windows (Cin_pad, TM) bf16 of the flattened,
           padded image.  Concatenated they cover lanes [base, base + 2*TM), so every tap window
           [off, off+TM) with off <= max_tap <= TM is a STATIC lane slice.
    w:     (C_sub, K) bf16, tap-major / channel-minor (matches the patch row order).
    b:     (C_sub, 1) f32.   o: (C_sub, TM) f32 — lane-dense in output positions, no Cout padding
           write amplification, already channel-major (NCHW).
    """
    win = jnp.concatenate([x0_ref[...], x1_ref[...]], axis=-1)                # (Cin_pad, 2*TM)
    patch = jnp.concatenate([win[:, off:off + tm] for off in tap_offsets],
                            axis=0)                                           # (K, TM) bf16
    acc = jnp.dot(w_ref[...], patch, preferred_element_type=jnp.float32)      # (C_sub, TM), MXU
    o_ref[...] = (acc + b_ref[...]).astype(o_ref.dtype)


# ----------------------------- wrappers (glue) -----------------------------

def get_normalized(alpha, margin=0.0):
    a = jax.nn.softmax(alpha, axis=-1)
    return a / (a.sum() + margin)


def fake_quant_jax(t, alphas):
    """Plain-JAX blend-of-bits fake quantizer (weights are a few KB: not worth Pallas launches)."""
    m = jnp.maximum(jnp.max(jnp.abs(t)), 1e-12).astype(jnp.float32)
    inv_m = 1.0 / m
    xn = jnp.clip(t.astype(jnp.float32) * inv_m, -1.0, 1.0)
    acc = jnp.zeros_like(xn)
    for i, bit in enumerate(BITS):
        lv = float(2 ** (bit - 1) - 1)
        acc = acc + jnp.round(xn * lv) * (alphas[i] * m / lv)
    return acc


def fake_quant_blend(t, alphas, out_dtype=jnp.bfloat16):
    """Two-pass tiled fake-quant blend over an arbitrary tensor, lane-dense (rows,128) tiles."""
    orig_shape = t.shape
    flat = t.reshape(-1).astype(jnp.float32)
    total = flat.shape[0]
    rows = pl.cdiv(total, 128)
    block_rows = _round_up(rows, 8) if rows <= _QROWS else _QROWS
    rows_p = _round_up(rows, block_rows)
    flat = jnp.pad(flat, (0, rows_p * 128 - total))
    x2d = flat.reshape(rows_p, 128)
    grid = rows_p // block_rows
    vlim = _vmem_limit_bytes()

    # pass 1: global max(|x|)  (padding zeros cannot change the max)
    m = pl.pallas_call(
        absmax_kernel,
        out_shape=jax.ShapeDtypeStruct((1, 1), jnp.float32),
        grid=(grid,),
        in_specs=[pl.BlockSpec((block_rows, 128), lambda i: (i, 0))],
        out_specs=pl.BlockSpec((1, 1), lambda i: (0, 0)),
        compiler_params=pltpu.CompilerParams(dimension_semantics=("arbitrary",),
                                             vmem_limit_bytes=vlim),
    )(x2d)
    m = jnp.maximum(m[0, 0], 1e-12)

    # precompute all scalar scales once (hoisted out of the per-bit / per-element path)
    scale_list = [1.0 / m]
    for idx, bit in enumerate(BITS):
        lv = float(2 ** (bit - 1) - 1)
        scale_list.append(alphas[idx] * m / lv)
    scales = jnp.stack(scale_list).astype(jnp.float32)

    # pass 2: tiled quantize + blend, scales via SMEM, bf16 output
    q = pl.pallas_call(
        quant_blend_kernel,
        out_shape=jax.ShapeDtypeStruct((rows_p, 128), out_dtype),
        grid=(grid,),
        in_specs=[pl.BlockSpec(memory_space=pltpu.MemorySpace.SMEM),
                  pl.BlockSpec((block_rows, 128), lambda i: (i, 0))],
        out_specs=pl.BlockSpec((block_rows, 128), lambda i: (i, 0)),
        compiler_params=pltpu.CompilerParams(dimension_semantics=("parallel",),
                                             vmem_limit_bytes=vlim),
    )(scales, x2d)
    return q.reshape(-1)[:total].reshape(orig_shape)


def _pick_m_tile(n_batch, m_out, max_tap, cin_p, c_sub, k):
    """VMEM-budgeted output-position tile (lane dim of the conv output), per-generation."""
    budget = min(_vmem_capacity_bytes() // 2, 48 * 1024 * 1024)   # headroom for Mosaic scratch
    fixed = 2 * c_sub * k * 2 + 2 * c_sub * 4                     # stationary weights + bias (x2 buf)
    per_tm = (4 * cin_p * 2      # two x window blocks, double-buffered, bf16
              + 2 * c_sub * 4    # out block, double-buffered, f32
              + 2 * cin_p * 2    # in-kernel (Cin_pad, 2*TM) concat, bf16
              + k * 2            # in-kernel (K, TM) patch, bf16
              + c_sub * 4)       # f32 accumulator
    tm = (budget - fixed) // max(per_tm, 1)
    tm = max(128, min(2048, (tm // 128) * 128))
    tm = min(tm, _round_up(m_out, 128))
    if n_batch == 1 and m_out > 256:
        # ensure >=2 "parallel" grid steps so the second TensorCore (v7x megacore) has work
        tm = min(tm, _round_up(-(-m_out // 2), 128))
    tm = max(tm, _round_up(max(max_tap, 1), 128))   # correctness: tap window must fit in 2 blocks
    return tm


def single_conv_forward(x, weight, bias, alpha_param, *, stride=1, padding=1, dilation=1):
    """SingleConv forward: fake-quantized acts & weights, then conv2d (+bias). NCHW in/out."""
    alphas = get_normalized(alpha_param).astype(jnp.float32)

    N, Cin, H, W = x.shape
    Cout, _, kh, kw = weight.shape

    # ---- geometry (stride>1 handled by stride-1 overcompute + subsampling) ----
    Hp, Wp = H + 2 * padding, W + 2 * padding
    H1 = Hp - dilation * (kh - 1)                 # stride-1 output rows
    W1 = Wp - dilation * (kw - 1)                 # stride-1 valid output cols
    H_out = (H1 - 1) // stride + 1
    W_out = (W1 - 1) // stride + 1
    M_out = H1 * Wp                               # stride-1 positions incl. width overcompute
    max_tap = (kh - 1) * dilation * Wp + (kw - 1) * dilation

    Cin_p = _round_up(Cin, 16)                    # bf16 sublane granule -> aligned patch concat
    C_sub = _round_up(Cout, 8)                    # output sublane granule (no 128-lane padding)
    K = kh * kw * Cin_p                           # MXU contraction = all taps * all channels

    TM = _pick_m_tile(N, M_out, max_tap, Cin_p, C_sub, K)
    M_pad = _round_up(M_out, TM)
    n_mt = M_pad // TM
    L_in = M_pad + TM                             # one extra TM block so window (mi+1) always exists

    # ---- activations: Pallas two-pass fake-quant (bf16, NCHW-native layout) ----
    x_q = fake_quant_blend(x, alphas, out_dtype=jnp.bfloat16)                 # (N,Cin,H,W) bf16
    x_q = jnp.pad(x_q, ((0, 0), (0, Cin_p - Cin),
                        (padding, padding), (padding, padding)))              # (N,Cin_p,Hp,Wp)
    x_q = x_q.reshape(N, Cin_p, Hp * Wp)
    x_q = jnp.pad(x_q, ((0, 0), (0, 0), (0, L_in - Hp * Wp)))                 # (N,Cin_p,L_in)

    # ---- weights/bias: plain-JAX fake-quant; (C_sub, K) bf16 tap-major/channel-minor ----
    w_q = fake_quant_jax(weight, alphas).astype(jnp.bfloat16)                 # (Cout,Cin,kh,kw)
    w_q = jnp.transpose(w_q, (0, 2, 3, 1))                                    # (Cout,kh,kw,Cin)
    w_q = jnp.pad(w_q, ((0, C_sub - Cout), (0, 0), (0, 0), (0, Cin_p - Cin)))
    w_q = w_q.reshape(C_sub, K)
    b_col = jnp.pad(bias.astype(jnp.float32), (0, C_sub - Cout)).reshape(C_sub, 1)

    tap_offsets = tuple(i * dilation * Wp + j * dilation
                        for i in range(kh) for j in range(kw))

    kern = functools.partial(conv_kernel, tap_offsets=tap_offsets, tm=TM)
    flops = 2 * N * M_pad * K * C_sub
    bytes_accessed = (2 * N * Cin_p * L_in * 2 + C_sub * K * 2 + C_sub * 4
                      + N * C_sub * M_pad * 4)

    out3d = pl.pallas_call(
        kern,
        out_shape=jax.ShapeDtypeStruct((N, C_sub, M_pad), jnp.float32),
        grid=(N, n_mt),
        in_specs=[pl.BlockSpec((None, Cin_p, TM), lambda n, m: (n, 0, m)),
                  pl.BlockSpec((None, Cin_p, TM), lambda n, m: (n, 0, m + 1)),
                  pl.BlockSpec((C_sub, K), lambda n, m: (0, 0)),      # stationary weights
                  pl.BlockSpec((C_sub, 1), lambda n, m: (0, 0))],     # stationary bias
        out_specs=pl.BlockSpec((None, C_sub, TM), lambda n, m: (n, 0, m)),
        compiler_params=pltpu.CompilerParams(dimension_semantics=("parallel", "parallel"),
                                             vmem_limit_bytes=_vmem_limit_bytes()),
        cost_estimate=pl.CostEstimate(flops=flops, transcendentals=0,
                                      bytes_accessed=bytes_accessed),
    )(x_q, x_q, w_q, b_col)

    # (N, C_sub, M_pad) is already channel-major: drop padding/overcompute, reshape, apply stride.
    out = out3d[:, :Cout, :M_out].reshape(N, Cout, H1, Wp)
    out = out[:, :, ::stride, 0:W1:stride]                      # (N, Cout, H_out, W_out)
    assert out.shape == (N, Cout, H_out, W_out)
    return out


# ----------------------------- main -----------------------------

if __name__ == "__main__":
    key = jax.random.PRNGKey(0)
    k1, k2, k3 = jax.random.split(key, 3)

    N, Cin, H, W = 2, 4, 16, 16
    Cout, kh, kw = 8, 3, 3

    x = jax.random.normal(k1, (N, Cin, H, W), dtype=jnp.float32)
    weight = 0.1 * jax.random.normal(k2, (Cout, Cin, kh, kw), dtype=jnp.float32)
    bias = 0.1 * jax.random.normal(k3, (Cout,), dtype=jnp.float32)
    # matches nn.Parameter(torch.ones(len(bits)) / len(bits))
    alpha_param = jnp.ones((len(BITS),), dtype=jnp.float32) / len(BITS)

    fwd = jax.jit(functools.partial(single_conv_forward, stride=1, padding=1, dilation=1))
    out = jax.block_until_ready(fwd(x, weight, bias, alpha_param))

    # plain-JAX reference (same quant math, bf16 operands, f32 conv accumulation)
    alphas_n = get_normalized(alpha_param).astype(jnp.float32)
    xq_ref = fake_quant_jax(x, alphas_n).astype(jnp.bfloat16).astype(jnp.float32)
    wq_ref = fake_quant_jax(weight, alphas_n).astype(jnp.bfloat16).astype(jnp.float32)
    ref = lax.conv_general_dilated(xq_ref, wq_ref, (1, 1), [(1, 1), (1, 1)],
                                   dimension_numbers=("NCHW", "OIHW", "NCHW"))
    ref = ref + bias[None, :, None, None]

    assert out.shape == (N, Cout, H, W), out.shape
    assert jnp.allclose(out, ref, atol=2e-3, rtol=2e-3), float(jnp.max(jnp.abs(out - ref)))
    print("KERNEL_OK")
</pallas_src>

<mosaic_0001>
module attributes {stable_mosaic.version = 11 : i64} {
  func.func @quant_blend_kernel(%arg0: i32, %arg1: memref<4xf32, #tpu.memory_space<smem>>, %arg2: memref<16x128xf32, #tpu.memory_space<vmem>>, %arg3: memref<16x128xbf16, #tpu.memory_space<vmem>>) attributes {dimension_semantics = [#tpu.dimension_semantics<parallel>], iteration_bounds = array<i64: 1>, scalar_prefetch = 0 : i64, scratch_operands = 0 : i64, tpu.core_type = #tpu.core_type<tc>, window_params = [{transform_indices = @transform_0, window_bounds = array<i64: 4>}, {transform_indices = @transform_1, window_bounds = array<i64: 16, 128>}, {transform_indices = @transform_2, window_bounds = array<i64: 16, 128>}]} {
    %c0 = arith.constant 0 : index
    %c0_0 = arith.constant 0 : index
    %0 = vector.load %arg2[%c0, %c0_0] : memref<16x128xf32, #tpu.memory_space<vmem>>, vector<16x128xf32>
    %c0_1 = arith.constant 0 : index
    %1 = memref.load %arg1[%c0_1] : memref<4xf32, #tpu.memory_space<smem>>
    %2 = vector.broadcast %1 : f32 to vector<16x128xf32>
    %3 = arith.mulf %0, %2 : vector<16x128xf32>
    %cst = arith.constant -1.000000e+00 : f32
    %cst_2 = arith.constant 1.000000e+00 : f32
    %4 = vector.broadcast %cst : f32 to vector<16x128xf32>
    %5 = arith.maximumf %4, %3 : vector<16x128xf32>
    %6 = vector.broadcast %cst_2 : f32 to vector<16x128xf32>
    %7 = arith.minimumf %6, %5 : vector<16x128xf32>
    %cst_3 = arith.constant 0.000000e+00 : f32
    %8 = vector.broadcast %cst_3 : f32 to vector<16x128xf32>
    %cst_4 = arith.constant 1.000000e+00 : f32
    %9 = vector.broadcast %cst_4 : f32 to vector<16x128xf32>
    %10 = arith.mulf %7, %9 : vector<16x128xf32>
    %11 = math.roundeven %10 : vector<16x128xf32>
    %c1 = arith.constant 1 : index
    %12 = memref.load %arg1[%c1] : memref<4xf32, #tpu.memory_space<smem>>
    %13 = vector.broadcast %12 : f32 to vector<16x128xf32>
    %14 = arith.mulf %11, %13 : vector<16x128xf32>
    %15 = arith.addf %8, %14 : vector<16x128xf32>
    %cst_5 = arith.constant 7.000000e+00 : f32
    %16 = vector.broadcast %cst_5 : f32 to vector<16x128xf32>
    %17 = arith.mulf %7, %16 : vector<16x128xf32>
    %18 = math.roundeven %17 : vector<16x128xf32>
    %c2 = arith.constant 2 : index
    %19 = memref.load %arg1[%c2] : memref<4xf32, #tpu.memory_space<smem>>
    %20 = vector.broadcast %19 : f32 to vector<16x128xf32>
    %21 = arith.mulf %18, %20 : vector<16x128xf32>
    %22 = arith.addf %15, %21 : vector<16x128xf32>
    %cst_6 = arith.constant 1.270000e+02 : f32
    %23 = vector.broadcast %cst_6 : f32 to vector<16x128xf32>
    %24 = arith.mulf %7, %23 : vector<16x128xf32>
    %25 = math.roundeven %24 : vector<16x128xf32>
    %c3 = arith.constant 3 : index
    %26 = memref.load %arg1[%c3] : memref<4xf32, #tpu.memory_space<smem>>
    %27 = vector.broadcast %26 : f32 to vector<16x128xf32>
    %28 = arith.mulf %25, %27 : vector<16x128xf32>
    %29 = arith.addf %22, %28 : vector<16x128xf32>
    %30 = arith.truncf %29 : vector<16x128xf32> to vector<16x128xbf16>
    %c0_7 = arith.constant 0 : index
    %c0_8 = arith.constant 0 : index
    %31 = vector.load %arg3[%c0_7, %c0_8] : memref<16x128xbf16, #tpu.memory_space<vmem>>, vector<16x128xbf16>
    tpu.vector_store %arg3[%c0_7, %c0_8], %30 {strides = array<i32>} : memref<16x128xbf16, #tpu.memory_space<vmem>>, vector<16x128xbf16>,
    return
  }
  func.func @transform_0(%arg0: i32) -> i32 {
    %c0_i32 = arith.constant 0 : i32
    %c0_i32_0 = arith.constant 0 : i32
    return %c0_i32 : i32
  }
  func.func @transform_1(%arg0: i32) -> (i32, i32) {
    %c0_i32 = arith.constant 0 : i32
    %c0_i32_0 = arith.constant 0 : i32
    return %arg0, %c0_i32 : i32, i32
  }
  func.func @transform_2(%arg0: i32) -> (i32, i32) {
    %c0_i32 = arith.constant 0 : i32
    %c0_i32_0 = arith.constant 0 : i32
    return %arg0, %c0_i32 : i32, i32
  }
}

module attributes {stable_mosaic.version = 11 : i64} {
  func.func @absmax_kernel(%arg0: i32, %arg1: memref<16x128xf32, #tpu.memory_space<vmem>>, %arg2: memref<1x1xf32, #tpu.memory_space<vmem>>) attributes {dimension_semantics = [#tpu.dimension_semantics<arbitrary>], iteration_bounds = array<i64: 1>, scalar_prefetch = 0 : i64, scratch_operands = 0 : i64, tpu.core_type = #tpu.core_type<tc>, window_params = [{transform_indices = @transform_0, window_bounds = array<i64: 16, 128>}, {pipeline_mode = #tpu.pipeline_mode<synchronous>, transform_indices = @transform_1, window_bounds = array<i64: 1, 1>}]} {
    %c0_i32 = arith.constant 0 : i32
    %0 = arith.cmpi eq, %arg0, %c0_i32 : i32
    %1 = arith.extui %0 : i1 to i32
    %c0_i32_0 = arith.constant 0 : i32
    %2 = arith.cmpi ne, %1, %c0_i32_0 : i32
    scf.if %2 {
      %cst_6 = arith.constant 0.000000e+00 : f32
      %13 = vector.broadcast %cst_6 : f32 to vector<1x1xf32>
      %c0_7 = arith.constant 0 : index
      %c0_8 = arith.constant 0 : index
      %14 = vector.load %arg2[%c0_7, %c0_8] : memref<1x1xf32, #tpu.memory_space<vmem>>, vector<1x1xf32>
      tpu.vector_store %arg2[%c0_7, %c0_8], %13 {strides = array<i32>} : memref<1x1xf32, #tpu.memory_space<vmem>>, vector<1x1xf32>,
    } else {
    }
    %c0 = arith.constant 0 : index
    %c0_1 = arith.constant 0 : index
    %3 = vector.load %arg1[%c0, %c0_1] : memref<16x128xf32, #tpu.memory_space<vmem>>, vector<16x128xf32>
    %4 = math.absf %3 : vector<16x128xf32>
    %5 = vector.shape_cast %4 : vector<16x128xf32> to vector<1x16x128xf32>
    %cst = arith.constant dense<0xFF800000> : vector<1xf32>
    %6 = vector.multi_reduction <maximumf>, %5, %cst [1, 2] : vector<1x16x128xf32> to vector<1xf32>
    %7 = vector.shape_cast %6 : vector<1xf32> to vector<1x1x1xf32>
    %8 = vector.extract %7[0, 0, 0] : f32 from vector<1x1x1xf32>
    %9 = vector.broadcast %8 : f32 to vector<1x1xf32>
    %c0_2 = arith.constant 0 : index
    %c0_3 = arith.constant 0 : index
    %10 = vector.load %arg2[%c0_2, %c0_3] : memref<1x1xf32, #tpu.memory_space<vmem>>, vector<1x1xf32>
    %11 = arith.maximumf %10, %9 : vector<1x1xf32>
    %c0_4 = arith.constant 0 : index
    %c0_5 = arith.constant 0 : index
    %12 = vector.load %arg2[%c0_4, %c0_5] : memref<1x1xf32, #tpu.memory_space<vmem>>, vector<1x1xf32>
    tpu.vector_store %arg2[%c0_4, %c0_5], %11 {strides = array<i32>} : memref<1x1xf32, #tpu.memory_space<vmem>>, vector<1x1xf32>,
    return
  }
  func.func @transform_0(%arg0: i32) -> (i32, i32) {
    %c0_i32 = arith.constant 0 : i32
    %c0_i32_0 = arith.constant 0 : i32
    return %arg0, %c0_i32 : i32, i32
  }
  func.func @transform_1(%arg0: i32) -> (i32, i32) {
    %c0_i32 = arith.constant 0 : i32
    %c0_i32_0 = arith.constant 0 : i32
    %c0_i32_1 = arith.constant 0 : i32
    return %c0_i32, %c0_i32_0 : i32, i32
  }
}

module attributes {stable_mosaic.version = 11 : i64} {
  func.func @conv_kernel(%arg0: i32, %arg1: i32, %arg2: memref<1x16x384xbf16, #tpu.memory_space<vmem>>, %arg3: memref<1x16x384xbf16, #tpu.memory_space<vmem>>, %arg4: memref<8x144xbf16, #tpu.memory_space<vmem>>, %arg5: memref<8x1xf32, #tpu.memory_space<vmem>>, %arg6: memref<1x8x384xf32, #tpu.memory_space<vmem>>) attributes {dimension_semantics = [#tpu.dimension_semantics<parallel>, #tpu.dimension_semantics<parallel>], iteration_bounds = array<i64: 2, 1>, scalar_prefetch = 0 : i64, scratch_operands = 0 : i64, tpu.core_type = #tpu.core_type<tc>, window_params = [{transform_indices = @transform_0, window_bounds = array<i64: 1, 16, 384>}, {transform_indices = @transform_1, window_bounds = array<i64: 1, 16, 384>}, {pipeline_mode = #tpu.pipeline_mode<synchronous>, transform_indices = @transform_2, window_bounds = array<i64: 8, 144>}, {pipeline_mode = #tpu.pipeline_mode<synchronous>, transform_indices = @transform_3, window_bounds = array<i64: 8, 1>}, {transform_indices = @transform_4, window_bounds = array<i64: 1, 8, 384>}]} {
    %c0 = arith.constant 0 : index
    %c0_0 = arith.constant 0 : index
    %c0_1 = arith.constant 0 : index
    %0 = vector.load %arg2[%c0, %c0_0, %c0_1] : memref<1x16x384xbf16, #tpu.memory_space<vmem>>, vector<1x16x384xbf16>
    %1 = vector.shape_cast %0 : vector<1x16x384xbf16> to vector<16x384xbf16>
    %c0_2 = arith.constant 0 : index
    %c0_3 = arith.constant 0 : index
    %c0_4 = arith.constant 0 : index
    %2 = vector.load %arg3[%c0_2, %c0_3, %c0_4] : memref<1x16x384xbf16, #tpu.memory_space<vmem>>, vector<1x16x384xbf16>
    %3 = vector.shape_cast %2 : vector<1x16x384xbf16> to vector<16x384xbf16>
    %4 = tpu.concatenate %1, %3 in 1 : vector<16x384xbf16>, vector<16x384xbf16> -> vector<16x768xbf16>
    %5 = vector.extract_strided_slice %4 {offsets = [0, 0], sizes = [16, 384], strides = [1, 1]} : vector<16x768xbf16> to vector<16x384xbf16>
    %6 = vector.extract_strided_slice %4 {offsets = [0, 1], sizes = [16, 384], strides = [1, 1]} : vector<16x768xbf16> to vector<16x384xbf16>
    %7 = vector.extract_strided_slice %4 {offsets = [0, 2], sizes = [16, 384], strides = [1, 1]} : vector<16x768xbf16> to vector<16x384xbf16>
    %8 = vector.extract_strided_slice %4 {offsets = [0, 18], sizes = [16, 384], strides = [1, 1]} : vector<16x768xbf16> to vector<16x384xbf16>
    %9 = vector.extract_strided_slice %4 {offsets = [0, 19], sizes = [16, 384], strides = [1, 1]} : vector<16x768xbf16> to vector<16x384xbf16>
    %10 = vector.extract_strided_slice %4 {offsets = [0, 20], sizes = [16, 384], strides = [1, 1]} : vector<16x768xbf16> to vector<16x384xbf16>
    %11 = vector.extract_strided_slice %4 {offsets = [0, 36], sizes = [16, 384], strides = [1, 1]} : vector<16x768xbf16> to vector<16x384xbf16>
    %12 = vector.extract_strided_slice %4 {offsets = [0, 37], sizes = [16, 384], strides = [1, 1]} : vector<16x768xbf16> to vector<16x384xbf16>
    %13 = vector.extract_strided_slice %4 {offsets = [0, 38], sizes = [16, 384], strides = [1, 1]} : vector<16x768xbf16> to vector<16x384xbf16>
    %14 = tpu.concatenate %5, %6, %7, %8, %9, %10, %11, %12, %13 in 0 : vector<16x384xbf16>, vector<16x384xbf16>, vector<16x384xbf16>, vector<16x384xbf16>, vector<16x384xbf16>, vector<16x384xbf16>, vector<16x384xbf16>, vector<16x384xbf16>, vector<16x384xbf16> -> vector<144x384xbf16>
    %c0_5 = arith.constant 0 : index
    %c0_6 = arith.constant 0 : index
    %15 = vector.load %arg4[%c0_5, %c0_6] : memref<8x144xbf16, #tpu.memory_space<vmem>>, vector<8x144xbf16>
    %cst = arith.constant dense<0.000000e+00> : vector<8x384xf32>
    %16 = tpu.matmul %15, %14, %cst {dimension_numbers = #tpu.dot_dimension_numbers<[1], [0], [0], [1], [0, 0, 1, 1], [], []>} : vector<8x144xbf16>, vector<144x384xbf16>, vector<8x384xf32> -> vector<8x384xf32>
    %c0_7 = arith.constant 0 : index
    %c0_8 = arith.constant 0 : index
    %17 = vector.load %arg5[%c0_7, %c0_8] : memref<8x1xf32, #tpu.memory_space<vmem>>, vector<8x1xf32>
    %18 = vector.broadcast %17 : vector<8x1xf32> to vector<8x384xf32>
    %19 = arith.addf %16, %18 : vector<8x384xf32>
    %c0_9 = arith.constant 0 : index
    %c0_10 = arith.constant 0 : index
    %c0_11 = arith.constant 0 : index
    %20 = vector.load %arg6[%c0_9, %c0_10, %c0_11] : memref<1x8x384xf32, #tpu.memory_space<vmem>>, vector<1x8x384xf32>
    %21 = vector.shape_cast %20 : vector<1x8x384xf32> to vector<8x384xf32>
    %22 = vector.shape_cast %19 : vector<8x384xf32> to vector<1x8x384xf32>
    tpu.vector_store %arg6[%c0_9, %c0_10, %c0_11], %22 {strides = array<i32>} : memref<1x8x384xf32, #tpu.memory_space<vmem>>, vector<1x8x384xf32>,
    return
  }
  func.func @transform_0(%arg0: i32, %arg1: i32) -> (i32, i32, i32) {
    %c0_i32 = arith.constant 0 : i32
    %c0_i32_0 = arith.constant 0 : i32
    return %arg0, %c0_i32, %arg1 : i32, i32, i32
  }
  func.func @transform_1(%arg0: i32, %arg1: i32) -> (i32, i32, i32) {
    %c1_i32 = arith.constant 1 : i32
    %0 = arith.addi %arg1, %c1_i32 : i32
    %c0_i32 = arith.constant 0 : i32
    %c0_i32_0 = arith.constant 0 : i32
    return %arg0, %c0_i32, %0 : i32, i32, i32
  }
  func.func @transform_2(%arg0: i32, %arg1: i32) -> (i32, i32) {
    %c0_i32 = arith.constant 0 : i32
    %c0_i32_0 = arith.constant 0 : i32
    %c0_i32_1 = arith.constant 0 : i32
    return %c0_i32, %c0_i32_0 : i32, i32
  }
  func.func @transform_3(%arg0: i32, %arg1: i32) -> (i32, i32) {
    %c0_i32 = arith.constant 0 : i32
    %c0_i32_0 = arith.constant 0 : i32
    %c0_i32_1 = arith.constant 0 : i32
    return %c0_i32, %c0_i32_0 : i32, i32
  }
  func.func @transform_4(%arg0: i32, %arg1: i32) -> (i32, i32, i32) {
    %c0_i32 = arith.constant 0 : i32
    %c0_i32_0 = arith.constant 0 : i32
    return %arg0, %c0_i32, %arg1 : i32, i32, i32
  }
}

</mosaic_0001>

<bundles_post_ra>
// kernel: single_conv_forward.3
= control target key start
LH: loop header
LB: loop body
LE: loop exit
PB: predicated region body
PF: predicated region fallthrough
CT: control target
= control target key end

     0   :  { %s97_s0 = inlined_call_operand.vmem [shape: f32[16,128], index: 0, kind: input, shape index: {}]   ;;  %s98_s1 = inlined_call_operand.hbm [shape: f32[1,1], index: 1, kind: output, shape index: {}]  }
   0x1   :  { %v15_v0 = vld [vmem:[%s97_s0] sm:$0xff]  ;;  %v16_v1 = vld [vmem:[%s97_s0 + $0x8] sm:$0xff] }
   0x2   :  { %6 = vsyncpa [#allocation3], 0  ;;  %v17_v2 = vand.u32 2147483647, %v15_v0  ;;  %v18_v3 = vand.u32 2147483647, %v16_v1 }
   0x3   :  { %vm13_vm0 = vcmask 0   ;;  %v74_v5 = vmov 0.0   ;;  %s75_s10 = smov [#allocation2]  }
   0x4   :  { %v19_v4 = vmax.f32.f32 %v17_v2, %v18_v3  ;;  %14 = vst.msk [vmem:[#allocation2] sm:$0x1] %vm13_vm0, %v74_v5  ;;  %s40_s0 = sshll.u32 %s75_s10, 4  ;;  %s41_s0 = int_to_ptr.vmem [resolvable:$true] %s40_s0 }
   0x5   :  { %s52_s12 = scalar_lea.vmem %s41_s0, 16  ;;  %s56_s13 = scalar_lea.vmem %s41_s0, 32 }
   0x6   :  { %20 = vmax.xlane.f32.xlu0 %v19_v4  ;;  %p53_p0 = scmp.ne.s32.totalorder %s41_s0, %s52_s12  ;;  %p57_p1 = scmp.lt.s32.totalorder %s41_s0, %s41_s0 }
   0x7   :  { %p58_p2 = scmp.lt.s32.totalorder %s56_s13, %s52_s12 }
   0x9   :  { %p59_p3 = por %p58_p2, %p57_p1 }
   0xb   :  { %v30_v13 = vld [vmem:[#allocation2] sm:$0x1]  ;;  %p60_p4 = pnand %p59_p3, %p53_p0 }
  0x8f   :  { %v21_v6 = vpop.xlane.xlu0 %20 }
  0x90   :  { %v22_v7 = vrot.slane %v21_v6, 4 }
  0x92   :  { %v23_v8 = vmax.f32 %v21_v6, %v22_v7 }
  0x94   :  { %v24_v9 = vrot.slane %v23_v8, 2 }
  0x96   :  { %v25_v10 = vmax.f32 %v23_v8, %v24_v9 }
  0x98   :  { %v26_v11 = vrot.slane %v25_v10, 1 }
  0x9a   :  { %v27_v12 = vmax.f32 %v25_v10, %v26_v11 }
  0x9c   :  { %48 = vpush %v27_v12 }
  0xcd   :  { %s49_s11 = spop %48 }
  0xce   :  { %v29_v14 = vstv %s49_s11 }
  0xcf   :  { %v31_v15 = vmax.f32 %v30_v13, %v29_v14 }
  0xd1   :  { %33 = vst.msk [vmem:[#allocation2] sm:$0x1] %vm13_vm0, %v31_v15 }
  0xd2   :  { %63 = shalt.err (!%p60_p4)
}
  0xd3   :  { %43 = dma.vmem_to_hbm [thread:$0]  %s41_s0, 16, %s98_s1, [#allocation3]  }
  0xd4   :  { %72 = dma.done.wait [#allocation3], 16  }
  0xd5   :  { %73 = vsyncadd [#allocation3], 4294967280 }
  0xd6   :  { %47 = vsyncpa [#allocation3], 1 }

// kernel: single_conv_forward.4
= control target key start
LH: loop header
LB: loop body
LE: loop exit
PB: predicated region body
PF: predicated region fallthrough
CT: control target
= control target key end

     0   :  { %7 = vsyncpa [#allocation3], 0  ;;  %s221_s0 = inlined_call_operand.vmem [shape: f32[4], index: 0, kind: input, shape index: {}]   ;;  %s222_s1 = inlined_call_operand.vmem [shape: f32[16,128], index: 1, kind: input, shape index: {}]   ;;  %s223_s2 = inlined_call_operand.vmem [shape: bf16[16,128], index: 2, kind: output, shape index: {}]  }
   0x1   :  { %s14_s11 = sshll.u32 %s221_s0, 4  ;;  %s15_s11 = int_to_ptr.vmem [resolvable:$true] %s14_s11 }
   0x2   :  { %s140_s12 = scalar_lea.vmem %s15_s11, 16  ;;  %p145_p1 = scmp.lt.s32.totalorder %s15_s11, %s15_s11 }
   0x3   :  { %p141_p0 = scmp.ne.s32.totalorder %s15_s11, %s140_s12  ;;  %p146_p2 = scmp.lt.s32.totalorder %s140_s12, %s140_s12 }
   0x5   :  { %p147_p3 = por %p146_p2, %p145_p1 }
   0x7   :  { %p148_p4 = pnand %p147_p3, %p141_p0 }
   0x9   :  { %151 = shalt.err (!%p148_p4)
}
   0xa   :  { %s154_s13 = smov [#allocation2]  }
   0xb   :  { %17 = dma.vmem_to_smem %s15_s11, 16, %s154_s13, [#allocation3]  }
   0xc   :  { %152 = dma.done.wait [#allocation3], 16  }
   0xd   :  { %153 = vsyncadd [#allocation3], 4294967280 }
   0xe   :  { %23 = sfence }
   0xf   :  { %s26_s14 = sld [smem:[#allocation2]]  ;;  %v24_v0 = vld [vmem:[%s222_s1] sm:$0xff]  ;;  %v25_v1 = vld [vmem:[%s222_s1 + $0x8] sm:$0xff] }
  0x10   :  { %s179_s18 = sld [smem:[#allocation2 + $0x1]] }
  0x11   :  { %s181_s19 = sld [smem:[#allocation2 + $0x2]] }
  0x12   :  { %s188_s1 = sld [smem:[#allocation2 + $0x3]] }
  0x15   :  { %v27_v2 = vstv %s26_s14 }
  0x16   :  { %v28_v3 = vmul.f32 %v27_v2, %v24_v0  ;;  %v29_v4 = vmul.f32 %v27_v2, %v25_v1  ;;  %v37_v10 = vstv %s179_s18 }
  0x17   :  { %v47_v40 = vstv %s181_s19 }
  0x18   :  { %v77_v5 = vclamps-f32 %v28_v3, 1.0  ;;  %v78_v6 = vclamps-f32 %v29_v4, 1.0  ;;  %v57_v60 = vstv %s188_s1 }
  0x1a   :  { %v91_v7 = vand.u32 2147483647, %v77_v5  ;;  %v93_v8 = vcvt.f32.s32 %v77_v5  ;;  %v101_v9 = vcvt.f32.s32 %v78_v6  ;;  %v42_v11 = vmul.f32 7.0, %v77_v5 }
  0x1b   :  { %v43_v12 = vmul.f32 7.0, %v78_v6  ;;  %v96_v14 = vand.u32 2147483648, %v77_v5  ;;  %v99_v15 = vand.u32 2147483647, %v78_v6  ;;  %v104_v16 = vand.u32 2147483648, %v78_v6 }
  0x1c   :  { %v94_v13 = vcvt.s32.f32 %v93_v8  ;;  %vm184_vm0 = vcmp.lt.f32.partialorder %v91_v7, 8388608.0  ;;  %v102_v18 = vcvt.s32.f32 %v101_v9  ;;  %v109_v19 = vcvt.f32.s32 %v42_v11 }
  0x1d   :  { %v52_v20 = vmul.f32 127.0, %v77_v5  ;;  %v107_v22 = vand.u32 2147483647, %v42_v11  ;;  %v112_v23 = vand.u32 2147483648, %v42_v11  ;;  %v117_v24 = vcvt.f32.s32 %v43_v12 }
  0x1e   :  { %v95_v21 = vand.u32 2147483647, %v94_v13  ;;  %v103_v25 = vand.u32 2147483647, %v102_v18  ;;  %v110_v26 = vcvt.s32.f32 %v109_v19  ;;  %v115_v27 = vand.u32 2147483647, %v43_v12 }
  0x1f   :  { %v120_v28 = vand.u32 2147483648, %v43_v12  ;;  %v118_v30 = vcvt.s32.f32 %v117_v24  ;;  %v53_v31 = vmul.f32 127.0, %v78_v6  ;;  %v123_v32 = vand.u32 2147483647, %v52_v20 }
  0x20   :  { %v97_v29 = vor.u32 %v96_v14, %v95_v21  ;;  %vm190_vm1 = vcmp.lt.f32.partialorder %v99_v15, 8388608.0  ;;  %v105_v34 = vor.u32 %v104_v16, %v103_v25  ;;  %v111_v35 = vand.u32 2147483647, %v110_v26 }
  0x21   :  { %v125_v36 = vcvt.f32.s32 %v52_v20  ;;  %vm196_vm2 = vcmp.lt.f32.partialorder %v107_v22, 8388608.0  ;;  %v119_v39 = vand.u32 2147483647, %v118_v30  ;;  %vm201_vm3 = vcmp.lt.f32.partialorder %v115_v27, 8388608.0 }
  0x22   :  { %v98_v37 = vsel %vm184_vm0, %v97_v29, %v77_v5  ;;  %v113_v41 = vor.u32 %v112_v23, %v111_v35  ;;  %v128_v44 = vand.u32 2147483648, %v52_v20  ;;  %v106_v45 = vsel %vm190_vm1, %v105_v34, %v78_v6 }
  0x23   :  { %v126_v43 = vcvt.s32.f32 %v125_v36  ;;  %v121_v46 = vor.u32 %v120_v28, %v119_v39  ;;  %vm207_vm4 = vcmp.lt.f32.partialorder %v123_v32, 8388608.0  ;;  %v133_v48 = vcvt.f32.s32 %v53_v31 }
  0x24   :  { %v38_v49 = vmul.f32 %v98_v37, %v37_v10  ;;  %v114_v50 = vsel %vm196_vm2, %v113_v41, %v42_v11  ;;  %v131_v52 = vand.u32 2147483647, %v53_v31  ;;  %v136_v56 = vand.u32 2147483648, %v53_v31 }
  0x25   :  { %v127_v51 = vand.u32 2147483647, %v126_v43  ;;  %v122_v53 = vsel %vm201_vm3, %v121_v46, %v43_v12  ;;  %v48_v54 = vmul.f32 %v114_v50, %v47_v40  ;;  %v134_v55 = vcvt.s32.f32 %v133_v48 }
  0x26   :  { %v39_v57 = vmul.f32 %v106_v45, %v37_v10  ;;  %v49_v58 = vmul.f32 %v122_v53, %v47_v40  ;;  %vm132_vm5 = vcmp.lt.f32.partialorder %v131_v52, 8388608.0 }
  0x27   :  { %v129_v59 = vor.u32 %v128_v44, %v127_v51  ;;  %v135_v61 = vand.u32 2147483647, %v134_v55  ;;  %v50_v62 = vadd.f32 %v48_v54, %v38_v49 }
  0x28   :  { %v51_v2 = vadd.f32 %v49_v58, %v39_v57 }
  0x29   :  { %v130_v63 = vsel %vm207_vm4, %v129_v59, %v52_v20  ;;  %v137_v0 = vor.u32 %v136_v56, %v135_v61 }
  0x2a   :  { %v58_v1 = vmul.f32 %v130_v63, %v57_v60 }
  0x2b   :  { %v138_v3 = vsel %vm132_vm5, %v137_v0, %v53_v31 }
  0x2c   :  { %v59_v4 = vmul.f32 %v138_v3, %v57_v60  ;;  %v60_v5 = vadd.f32 %v58_v1, %v50_v62 }
  0x2e   :  { %v61_v6 = vadd.f32 %v59_v4, %v51_v2 }
  0x30   :  { %v89_v7 = vpack.c.bf16 %v61_v6, %v60_v5 }
  0x32   :  { %90 = vst [vmem:[%s223_s2] sm:$0xff] %v89_v7  }
  0x33   :  { %76 = vsyncpa [#allocation3], 1 }

// kernel: single_conv_forward.5
= control target key start
LH: loop header
LB: loop body
LE: loop exit
PB: predicated region body
PF: predicated region fallthrough
CT: control target
= control target key end

     0   :  { %s861_s15 = smov 0   ;;  %s863_s16 = smov 0   ;;  %s995_s0 = inlined_call_operand.vmem [shape: bf16[2,16,768], index: 0, kind: input, shape index: {}, may-alias: {0,1}]   ;;  %s996_s1 = inlined_call_operand.vmem [shape: bf16[2,16,768], index: 1, kind: input, shape index: {}, may-alias: {0,1}]   ;;  %s997_s2 = inlined_call_operand.vmem [shape: bf16[8,144], index: 2, kind: input, shape index: {}]   ;;  %s998_s3 = inlined_call_operand.vmem [shape: f32[8,1], index: 3, kind: input, shape index: {}]   ;;  %s999_s4 = inlined_call_operand.vmem [shape: f32[2,8,384], index: 4, kind: output, shape index: {}]  }
   0x1   :  { %s865_s17 = smov 0   ;;  %s867_s18 = smov 0  }
   0x2   :  { %s869_s19 = smov 0  }
   0x3 LB: > { %s26_s20 = sadd.s32 1, %s821_s18  ;;  %p42_p1 = scmp.ne.s32.totalorder %s813_s16, %s809_s15  ;;  %s825_s19 = sphi %s869_s19, %s14_s19   ;;  %s821_s18 = sphi %s867_s18, %s1004_s18   ;;  %s817_s17 = sphi %s865_s17, %s1003_s17   ;;  %s813_s16 = sphi %s863_s16, %s1002_s16   ;;  %s809_s15 = sphi %s861_s15, %s1001_s15  }
   0x4   : > { %p28_p0 = scmp.ge.s32.totalorder %s26_s20, 2  ;;  %p43_p2 = scmp.eq.s32.totalorder %s825_s19, 0 }
   0x5   : > { %s35_s23 = sadd.s32 1, %s813_s16  ;;  %p700_p5 = scmp.ge.s32.totalorder %s825_s19, 2 }
   0x6   : > { %s1006_s20 = smov (%p28_p0, %s26_s20), 0  ;;  %p892_p3 = por %p43_p2, %p42_p1 }
   0x7   : > { %s30_s22 = ssub.s32 %s821_s18, %s1006_s20  ;;  %174 = sbr.rel (%p700_p5) target bundleno = 26 (0x1a), region = 24 }
   0x8   : > { %p33_p4 = scmp.eq.s32.totalorder %s30_s22, 0 }
   0xa   : > { %s900_s24 = scalar_select %p33_p4, %s813_s16, %s35_s23  }
   0xc   : > { %177 = sbr.rel (!%p892_p3) target bundleno = 19 (0x13), region = 28  ;;  %s179_s25 = sand.u32 (%p892_p3), 1, %s813_s16  }
   0xd   : > { %s726_s26 = smul.u32 (%p892_p3), 48, %s821_s18 }
   0xe   : > { %s725_s27 = smul.u32 (%p892_p3), 24, %s179_s25 }
   0xf   : > { %s186_s30 = scalar_lea.vmem (%p892_p3), %s995_s0, %s726_s26 }
  0x10   : > { %v201_v0 = vld [vmem:[%s186_s30] sm:$0xff] (%p892_p3)  ;;  %v203_v1 = vld [vmem:[%s186_s30 + $0x18] sm:$0xff] (%p892_p3)  ;;  %v702_v2 = vld [vmem:[%s186_s30 + $0x8] sm:$0xf] (%p892_p3)  ;;  %s181_s5 = scalar_lea.vmem (%p892_p3), [#allocation2], %s725_s27 }
  0x11   : > { %202 = vst [vmem:[%s181_s5] sm:$0xff] %v201_v0  ;;  %204 = vst [vmem:[%s181_s5 + $0xc] sm:$0xff] %v203_v1  ;;  %v704_v3 = vld [vmem:[%s186_s30 + $0x20] sm:$0xf] }
  0x12   : > { %703 = vst [vmem:[%s181_s5 + $0x8] sm:$0xf] %v702_v2  ;;  %705 = vst [vmem:[%s181_s5 + $0x14] sm:$0xf] %v704_v3 }
  0x13 PF: > { %222 = sbr.rel (!%p892_p3) target bundleno = 26 (0x1a), region = 54  ;;  %s224_s6 = sand.u32 (%p892_p3), 1, %s813_s16  }
  0x14   : > { %s706_s7 = smul.u32 (%p892_p3), 48, %s821_s18 }
  0x15   : > { %s727_s8 = smul.u32 (%p892_p3), 24, %s224_s6 }
  0x16   : > { %s619_s11 = scalar_lea.vmem (%p892_p3), %s996_s1, %s706_s7 }
  0x17   : > { %v707_v4 = vld [vmem:[%s619_s11 + $0xc] sm:$0xff] (%p892_p3)  ;;  %v708_v5 = vld [vmem:[%s619_s11 + $0x24] sm:$0xff] (%p892_p3)  ;;  %v709_v6 = vld [vmem:[%s619_s11 + $0x14] sm:$0xf] (%p892_p3)  ;;  %s226_s12 = scalar_lea.vmem (%p892_p3), [#allocation3], %s727_s8 }
  0x18   : > { %248 = vst [vmem:[%s226_s12] sm:$0xff] %v707_v4  ;;  %250 = vst [vmem:[%s226_s12 + $0xc] sm:$0xff] %v708_v5  ;;  %v711_v7 = vld [vmem:[%s619_s11 + $0x2c] sm:$0xf] }
  0x19   : > { %710 = vst [vmem:[%s226_s12 + $0x8] sm:$0xf] %v709_v6  ;;  %712 = vst [vmem:[%s226_s12 + $0x14] sm:$0xf] %v711_v7 }
  0x1a PF: > { %p713_p6 = scmp.ge.s32.totalorder %s825_s19, 1  ;;  %p267_p7 = scmp.lt.s32.totalorder %s825_s19, 3 }
  0x1c   : > { %p268_p8 = pnand %p713_p6, %p267_p7 }
  0x1d   : > { %s274_s13 = sand.u32 (!%p268_p8), 1, %s809_s15   ;;  %s828_s22 = smov (!%p268_p8), 91  }
  0x1e   : > { %271 = sbr.rel (%p268_p8) target bundleno = 415 (0x19f), region = 80  ;;  %s829_s15 = smov (!%p268_p8), 92  }
  0x1f   : > { %s728_s14 = smul.u32 (!%p268_p8), 24, %s274_s13  ;;  %s830_s25 = smov (!%p268_p8), 108  }
  0x20   : > { %s831_s26 = smov (!%p268_p8), 109   ;;  %s832_s27 = smov (!%p268_p8), 110  }
  0x21   : > { %s276_s21 = scalar_lea.vmem (!%p268_p8), [#allocation2], %s728_s14  ;;  %s283_s23 = scalar_lea.vmem (!%p268_p8), [#allocation3], %s728_s14 }
  0x22   : > { %s833_s28 = smov (!%p268_p8), 126   ;;  %s834_s29 = smov (!%p268_p8), 127  }
  0x23   : > { %v827_v8 = vmov 0   ;;  %v922_v9 = vld [vmem:[%s276_s21 + $0x4] ss:$12 sps:$4 sm:$0xff]   ;;  %v924_v10 = vld [vmem:[%s276_s21] ss:$12 sps:$4 sm:$0xff]   ;;  %vm488_vm0 = vcmask 130048  }
  0x24   : > { %533 = vmatprep.subr.bf16.mxu1 %v827_v8  ;;  %779 = vset.pattern.permute.xlu0 %v827_v8  ;;  %v927_v11 = vld [vmem:[%s276_s21 + $0x8] ss:$12 sps:$4 sm:$0xff]   ;;  %v784_v12 = vld [vmem:[%s283_s23] ss:$12 sps:$4 sm:$0xff]   ;;  %s835_s6 = smov 90   ;;  %vm453_vm1 = vcmask 744448  }
  0x25   : > { %447 = vrot.lane.b32.xlu0 %v922_v9, %s828_s22  ;;  %445 = vrot.lane.b32.xlu1 %v924_v10, %s828_s22  ;;  %v950_v13 = vld [vmem:[%s997_s2] sm:$0xff]  ;;  %vm438_vm2 = vcmask 752640   ;;  %vm423_vm3 = vcmask 883712   ;;  %vm408_vm4 = vcmask 891904   ;;  %vm393_vm5 = vcmask 900096   ;;  %p318_p9 = scmp.lt.s32.totalorder %s817_s17, 1 }
  0x26   : > { %v720_v14 = vcombine.high %v950_v13, %v950_v13  ;;  %v476_v15 = vld [vmem:[%s998_s3] sm:$0xff]  ;;  %vm378_vm6 = vcmask 1031168   ;;  %vm363_vm7 = vcmask 1039360   ;;  %vm468_vm8 = vcmask 736256  }
  0x27   : > { %v719_v7 = vcombine.low %v950_v13, %v950_v13  ;;  %s1008_s17 = smov (!%p318_p9, %s817_s17), 1 }
  0x28   : > { %721 = vmatprep.mubr.msk.bf16.mxu0 %vm488_vm0, %v720_v14  ;;  %722 = vmatprep.mubr.msk.bf16.mxu1 %vm488_vm0, %v720_v14  ;;  %s729_s9 = smul.u32 24, %s1008_s17 }
  0x29   : > { %449 = vrot.lane.b32.xlu0 %v927_v11, %s828_s22  ;;  %451 = vrot.lane.b32.xlu1 %v784_v12, %s828_s22 }
  0x2a   : > { %s325_s12 = scalar_lea.vmem %s999_s4, %s729_s9 }
  0x2d   : > { %432 = vrot.lane.b32.xlu0 %v922_v9, %s829_s15  ;;  %434 = vrot.lane.b32.xlu1 %v927_v11, %s829_s15 }
  0x31   : > { %430 = vrot.lane.b32.xlu0 %v924_v10, %s829_s15  ;;  %436 = vrot.lane.b32.xlu1 %v784_v12, %s829_s15 }
  0x35   : > { %417 = vrot.lane.b32.xlu0 %v922_v9, %s830_s25  ;;  %419 = vrot.lane.b32.xlu1 %v927_v11, %s830_s25 }
  0x39   : > { %415 = vrot.lane.b32.xlu0 %v924_v10, %s830_s25  ;;  %421 = vrot.lane.b32.xlu1 %v784_v12, %s830_s25 }
  0x3d   : > { %402 = vrot.lane.b32.xlu0 %v922_v9, %s831_s26  ;;  %404 = vrot.lane.b32.xlu1 %v927_v11, %s831_s26 }
  0x41   : > { %400 = vrot.lane.b32.xlu0 %v924_v10, %s831_s26  ;;  %406 = vrot.lane.b32.xlu1 %v784_v12, %s831_s26 }
  0x45   : > { %387 = vrot.lane.b32.xlu0 %v922_v9, %s832_s27  ;;  %389 = vrot.lane.b32.xlu1 %v927_v11, %s832_s27 }
  0x49   : > { %385 = vrot.lane.b32.xlu0 %v924_v10, %s832_s27  ;;  %391 = vrot.lane.b32.xlu1 %v784_v12, %s832_s27 }
  0x4d   : > { %372 = vrot.lane.b32.xlu0 %v922_v9, %s833_s28  ;;  %374 = vrot.lane.b32.xlu1 %v927_v11, %s833_s28 }
  0x51   : > { %370 = vrot.lane.b32.xlu0 %v924_v10, %s833_s28  ;;  %376 = vrot.lane.b32.xlu1 %v784_v12, %s833_s28 }
  0x55   : > { %357 = vrot.lane.b32.xlu0 %v922_v9, %s834_s29  ;;  %359 = vrot.lane.b32.xlu1 %v927_v11, %s834_s29 }
  0x59   : > { %355 = vrot.lane.b32.xlu0 %v924_v10, %s834_s29  ;;  %361 = vrot.lane.b32.xlu1 %v784_v12, %s834_s29 }
  0x5d   : > { %462 = vrot.lane.b32.xlu0 %v922_v9, %s835_s6  ;;  %464 = vrot.lane.b32.xlu1 %v927_v11, %s835_s6 }
  0x61   : > { %460 = vrot.lane.b32.xlu0 %v924_v10, %s835_s6  ;;  %466 = vrot.lane.b32.xlu1 %v784_v12, %s835_s6 }
  0x65   : > { %479 = vperm.xlu0 %779, %v476_v15  }
  0x97   : > { %v448_v16 = vpop.permute.xlu0 %447  ;;  %v446_v17 = vpop.permute.xlu1 %445 }
  0x98   : > { %v454_v22 = vsel %vm453_vm1, %v446_v17, %v448_v16 }
  0x9b   : > { %v450_v18 = vpop.permute.xlu0 %449  ;;  %v452_v19 = vpop.permute.xlu1 %451 }
  0x9c   : > { %v455_v20 = vsel %vm453_vm1, %v448_v16, %v450_v18  ;;  %v456_v21 = vsel %vm453_vm1, %v450_v18, %v452_v19 }
  0x9d   : > { %492 = vmatprep.subr.bf16.mxu0 %v455_v20  ;;  %534 = vmatpush1.bf16.msra.mxu1 %v456_v21 }
  0x9e   : > { %493 = vmatpush1.bf16.msra.mxu0 %v454_v22  ;;  %535 = vmatprep.subr.bf16.mxu1 %v827_v8 }
  0x9f   : > { %v433_v23 = vpop.permute.xlu0 %432  ;;  %v435_v24 = vpop.permute.xlu1 %434 }
  0xa0   : > { %v440_v25 = vsel %vm438_vm2, %v433_v23, %v435_v24 }
  0xa1   : > { %494 = vmatprep.subr.bf16.mxu0 %v440_v25 }
  0xa3   : > { %v431_v26 = vpop.permute.xlu0 %430  ;;  %v437_v27 = vpop.permute.xlu1 %436 }
  0xa4   : > { %v439_v28 = vsel %vm438_vm2, %v431_v26, %v433_v23  ;;  %v441_v29 = vsel %vm438_vm2, %v435_v24, %v437_v27 }
  0xa5   : > { %495 = vmatpush1.bf16.msra.mxu0 %v439_v28  ;;  %536 = vmatpush1.bf16.msra.mxu1 %v441_v29 }
  0xa6   : > { %537 = vmatprep.subr.bf16.mxu1 %v827_v8 }
  0xa7   : > { %v418_v30 = vpop.permute.xlu0 %417  ;;  %v420_v31 = vpop.permute.xlu1 %419 }
  0xa8   : > { %v425_v32 = vsel %vm423_vm3, %v418_v30, %v420_v31 }
  0xa9   : > { %496 = vmatprep.subr.bf16.mxu0 %v425_v32 }
  0xab   : > { %v416_v33 = vpop.permute.xlu0 %415  ;;  %v422_v34 = vpop.permute.xlu1 %421 }
  0xac   : > { %v424_v35 = vsel %vm423_vm3, %v416_v33, %v418_v30  ;;  %v426_v36 = vsel %vm423_vm3, %v420_v31, %v422_v34 }
  0xad   : > { %497 = vmatpush1.bf16.msra.mxu0 %v424_v35  ;;  %538 = vmatpush1.bf16.msra.mxu1 %v426_v36 }
  0xae   : > { %539 = vmatprep.subr.bf16.mxu1 %v827_v8 }
  0xaf   : > { %v403_v37 = vpop.permute.xlu0 %402  ;;  %v405_v38 = vpop.permute.xlu1 %404 }
  0xb0   : > { %v410_v39 = vsel %vm408_vm4, %v403_v37, %v405_v38 }
  0xb1   : > { %498 = vmatprep.subr.bf16.mxu0 %v410_v39 }
  0xb3   : > { %v401_v40 = vpop.permute.xlu0 %400  ;;  %v407_v41 = vpop.permute.xlu1 %406 }
  0xb4   : > { %v409_v42 = vsel %vm408_vm4, %v401_v40, %v403_v37  ;;  %v411_v43 = vsel %vm408_vm4, %v405_v38, %v407_v41 }
  0xb5   : > { %499 = vmatpush1.bf16.msra.mxu0 %v409_v42  ;;  %540 = vmatpush1.bf16.msra.mxu1 %v411_v43 }
  0xb6   : > { %541 = vmatprep.subr.bf16.mxu1 %v827_v8 }
  0xb7   : > { %v388_v44 = vpop.permute.xlu0 %387  ;;  %v390_v45 = vpop.permute.xlu1 %389 }
  0xb8   : > { %v395_v46 = vsel %vm393_vm5, %v388_v44, %v390_v45 }
  0xb9   : > { %500 = vmatprep.subr.bf16.mxu0 %v395_v46 }
  0xbb   : > { %v386_v47 = vpop.permute.xlu0 %385  ;;  %v392_v48 = vpop.permute.xlu1 %391 }
  0xbc   : > { %v394_v49 = vsel %vm393_vm5, %v386_v47, %v388_v44  ;;  %v396_v50 = vsel %vm393_vm5, %v390_v45, %v392_v48 }
  0xbd   : > { %501 = vmatpush1.bf16.msra.mxu0 %v394_v49  ;;  %542 = vmatpush1.bf16.msra.mxu1 %v396_v50 }
  0xbe   : > { %543 = vmatprep.subr.bf16.mxu1 %v827_v8 }
  0xbf   : > { %v373_v51 = vpop.permute.xlu0 %372  ;;  %v375_v52 = vpop.permute.xlu1 %374 }
  0xc0   : > { %v380_v53 = vsel %vm378_vm6, %v373_v51, %v375_v52 }
  0xc1   : > { %502 = vmatprep.subr.bf16.mxu0 %v380_v53 }
  0xc3   : > { %v371_v54 = vpop.permute.xlu0 %370  ;;  %v377_v55 = vpop.permute.xlu1 %376 }
  0xc4   : > { %v379_v56 = vsel %vm378_vm6, %v371_v54, %v373_v51  ;;  %v381_v57 = vsel %vm378_vm6, %v375_v52, %v377_v55 }
  0xc5   : > { %503 = vmatpush1.bf16.msra.mxu0 %v379_v56  ;;  %544 = vmatpush1.bf16.msra.mxu1 %v381_v57 }
  0xc6   : > { %545 = vmatprep.subr.bf16.mxu1 %v827_v8 }
  0xc7   : > { %v358_v58 = vpop.permute.xlu0 %357  ;;  %v360_v59 = vpop.permute.xlu1 %359 }
  0xc8   : > { %v365_v60 = vsel %vm363_vm7, %v358_v58, %v360_v59 }
  0xc9   : > { %504 = vmatprep.subr.bf16.mxu0 %v365_v60 }
  0xcb   : > { %v356_v61 = vpop.permute.xlu0 %355  ;;  %v362_v62 = vpop.permute.xlu1 %361 }
  0xcc   : > { %v364_v63 = vsel %vm363_vm7, %v356_v61, %v358_v58  ;;  %v366_v0 = vsel %vm363_vm7, %v360_v59, %v362_v62 }
  0xcd   : > { %505 = vmatpush1.bf16.msra.mxu0 %v364_v63  ;;  %546 = vmatpush1.bf16.msra.mxu1 %v366_v0 }
  0xce   : > { %506 = vmatprep.subr.bf16.mxu0 %v922_v9  ;;  %547 = vmatprep.subr.bf16.mxu1 %v827_v8 }
  0xcf   : > { %v463_v1 = vpop.permute.xlu0 %462  ;;  %v465_v2 = vpop.permute.xlu1 %464 }
  0xd0   : > { %v470_v3 = vsel %vm468_vm8, %v463_v1, %v465_v2 }
  0xd1   : > { %507 = vmatpush1.bf16.msra.mxu0 %v924_v10  ;;  %548 = vmatpush1.bf16.msra.mxu1 %v927_v11 }
  0xd2   : > { %522 = vmatprep.subr.bf16.mxu0 %v470_v3  ;;  %563 = vmatprep.subr.bf16.mxu1 %v827_v8 }
  0xd3   : > { %v461_v4 = vpop.permute.xlu0 %460  ;;  %v467_v5 = vpop.permute.xlu1 %466 }
  0xd4   : > { %v469_v6 = vsel %vm468_vm8, %v461_v4, %v463_v1  ;;  %v471_v9 = vsel %vm468_vm8, %v465_v2, %v467_v5 }
  0xd5   : > { %523 = vmatpush2.bf16.msra.mxu0 %v469_v6  ;;  %564 = vmatpush2.bf16.msra.mxu1 %v471_v9 }
  0xd8   : > { %525 = vmatmul.mubr.bf16.vlgmr.msra.gmra.mxu0 %v719_v7  ;;  %566 = vmatmul.mubr.bf16.vlgmr.msra.gmra.mxu1 %v719_v7 }
  0xe0   : > { %v480_v10 = vpop.permute.xlu0 %479 }
 0x198   : > { %v526_v11 = vpop.f32.mrf.mxu0  ;;  %v567_v12 = vpop.f32.mrf.mxu1 }
 0x199   : > { %v527_v8 = vadd.f32 %v526_v11, %v480_v10  ;;  %v568_v14 = vadd.f32 %v567_v12, %v480_v10 }
 0x19a   : > { %v528_v15 = vpop.f32.mrf.mxu0  ;;  %v569_v16 = vpop.f32.mrf.mxu1 }
 0x19b   : > { %573 = vst [vmem:[%s325_s12] sm:$0xff] %v527_v8  ;;  %v529_v13 = vadd.f32 %v528_v15, %v480_v10  ;;  %575 = vst [vmem:[%s325_s12 + $0x10] sm:$0xff] %v568_v14 }
 0x19c   : > { %v530_v17 = vpop.f32.mrf.mxu0  ;;  %v570_v18 = vpop.f32.mrf.mxu1 }
 0x19d   : > { %574 = vst [vmem:[%s325_s12 + $0x8] sm:$0xff] %v529_v13 }
 0x19e   : > { %v531_v19 = vpop.f32.mrf.mxu0  ;;  %v571_v20 = vpop.f32.mrf.mxu1 }
 0x19f PF: > { %s14_s19 = sadd.s32 1, %s825_s19   ;;  %s1001_s15 = smov %s813_s16 }
 0x1a0   : > { %p11_p10 = scmp.ge.s32.totalorder %s14_s19, 4   ;;  %s1002_s16 = smov %s900_s24 }
 0x1a1   : > { %s1003_s17 = smov %s821_s18  ;;  %s1004_s18 = smov %s1006_s20 }
 0x1a2   :  { %13 = sbr.rel (!%p11_p10) target bundleno = 3 (0x3), region = 143 }

</bundles_post_ra>
